<compile_context>
chip_gen: v7x
topology: tpu7x:2x2x1
jax: 0.10.0
libtpu: 0.0.40
codegen_flags: <defaults>
</compile_context>

<pallas_src>
import math

import jax
import jax.numpy as jnp
import numpy as np
from jax.experimental import pallas as pl
from jax.experimental.pallas import tpu as pltpu


def _fuzzy_kernel(x_ref, w_ref, o_ref):
    # x_ref: (TB, D); w_ref: (Kp, O_out) = [nA ; B2 ; nC ; 0]; o_ref: (TB, O_out)
    x = x_ref[...]
    tb, d = x.shape
    pad_w = w_ref.shape[0] - 2 * d          # >= 1 columns; row 2D of Wcat is nC, rest 0
    xcat = jnp.concatenate(
        [x * x, x, jnp.ones((tb, pad_w), dtype=x.dtype)], axis=-1)   # (TB, Kp)
    t = jnp.dot(xcat, w_ref[...], preferred_element_type=jnp.float32)
    t = jnp.minimum(t, 0.0)                 # exact math gives t <= 0; clamp fp drift
    o_ref[...] = jnp.exp(t).astype(o_ref.dtype)


def fuzzy_layer_prepare(mean_value, sigma, input_dim, output_dim):
    """Param-only preprocessing (O(D*O)).  Call once per parameter update and
    cache the result; this keeps the XLA scatter-adds out of the hot path."""
    D, O = input_dim, output_dim
    dtype = jnp.float32
    m = mean_value.reshape(D, O).astype(dtype)                 # m[i,o] = mean[i*O+o]
    w = 1.0 / jnp.square(sigma.reshape(D, O).astype(dtype))    # inv sigma^2

    # Static index map: term (i, o) reads x column j = (i*O + o) % D.
    i_idx = np.arange(D)[:, None]
    o_idx = np.broadcast_to(np.arange(O)[None, :], (D, O))
    j_idx = (i_idx * O + o_idx) % D

    nA = jnp.zeros((D, O), dtype).at[j_idx, o_idx].add(-w)            # coeff of x^2
    B2 = jnp.zeros((D, O), dtype).at[j_idx, o_idx].add(2.0 * m * w)   # coeff of x
    nC = -jnp.sum(m * m * w, axis=0)                                   # constant, (O,)

    # Lane-dense padding only when it is cheap relative to O (O >= 128).
    if O >= 128 and O % 128 != 0:
        O_out = ((O + 127) // 128) * 128
    else:
        O_out = O

    K = 2 * D + 1                      # [x^2 | x | 1]
    Kp = ((K + 7) // 8) * 8            # sublane-align the contraction dim
    Wcat = jnp.zeros((Kp, O_out), dtype)
    Wcat = Wcat.at[:D, :O].set(nA)
    Wcat = Wcat.at[D:2 * D, :O].set(B2)
    Wcat = Wcat.at[2 * D, :O].set(nC)
    return Wcat


def fuzzy_layer_apply(x, Wcat, input_dim, output_dim, *, batch_tile=1024):
    """x: (B, input_dim); Wcat: output of fuzzy_layer_prepare."""
    B = x.shape[0]
    D, O = input_dim, output_dim
    Kp, O_out = Wcat.shape
    dtype = jnp.float32

    # Batch tiling: full B for tiny inputs, otherwise a multiple-of-8 tile that
    # gives >= 2 grid steps (so v7x's 2 TensorCores both get work) capped at
    # batch_tile rows so per-step HBM traffic amortizes the ~0.35us overhead.
    if B <= 8:
        TB = B
    else:
        half_up = ((-(-B // 2)) + 7) // 8 * 8
        TB = max(8, min(batch_tile, half_up))
    grid = (pl.cdiv(B, TB),)

    # Live VMEM: double-buffered x tile + out tile + resident Wcat + in-kernel
    # temporaries (xcat, t).  2x headroom, clamped to [32 MiB, 64 MiB].
    est = 4 * (2 * TB * D + 2 * Kp * O_out + 2 * TB * O_out + 2 * TB * Kp)
    vmem_limit = int(min(64 * 1024 * 1024, max(32 * 1024 * 1024, 2 * est)))

    cost = pl.CostEstimate(
        flops=2 * B * Kp * O_out + B * (D + 2 * O_out),   # fused matmul + x^2 + clamp
        transcendentals=B * O_out,
        bytes_accessed=4 * (B * D + Kp * O_out + B * O_out),
    )

    out = pl.pallas_call(
        _fuzzy_kernel,
        out_shape=jax.ShapeDtypeStruct((B, O_out), dtype),
        grid=grid,
        in_specs=[
            pl.BlockSpec((TB, D), lambda i: (i, 0)),        # x tile marches over batch
            pl.BlockSpec((Kp, O_out), lambda i: (0, 0)),    # fused params stay resident
        ],
        out_specs=pl.BlockSpec((TB, O_out), lambda i: (i, 0)),
        compiler_params=pltpu.CompilerParams(
            dimension_semantics=("parallel",),              # batch axis -> megacore
            vmem_limit_bytes=vmem_limit,
        ),
        cost_estimate=cost,
    )(x.astype(dtype), Wcat)
    return out if O_out == O else out[:, :O]


def fuzzy_layer_pallas(x, mean_value, sigma, input_dim, output_dim, *,
                       batch_tile=1024):
    """Convenience one-shot wrapper (prepare + apply).  For repeated calls with
    fixed params, call fuzzy_layer_prepare once and reuse fuzzy_layer_apply."""
    Wcat = fuzzy_layer_prepare(mean_value, sigma, input_dim, output_dim)
    return fuzzy_layer_apply(x, Wcat, input_dim, output_dim,
                             batch_tile=batch_tile)


def fuzzy_layer_ref(x, mean_value, sigma, input_dim, output_dim):
    """Pure-JAX reference mirroring the PyTorch forward op-for-op."""
    B = x.shape[0]
    x_exp = jnp.tile(x, (1, output_dim))                        # repeat(1, O)
    memb = jnp.exp(-jnp.square(x_exp - mean_value) / jnp.square(sigma))
    return jnp.prod(memb.reshape(B, input_dim, output_dim), axis=1)


if __name__ == "__main__":
    input_dim = 16
    output_dim = 8
    batch = 4

    key = jax.random.PRNGKey(0)
    kx, km = jax.random.split(key)

    # Deterministic parameter init matching the module's __init__:
    #   mean_value: xavier_uniform_ on (1, O*D) -> U(-a, a), a = sqrt(6/(O*D+1))
    #   sigma:      ones
    n = output_dim * input_dim
    a = math.sqrt(6.0 / (n + 1))
    mean_value = jax.random.uniform(
        km, (1, n), dtype=jnp.float32, minval=-a, maxval=a
    )
    sigma = jnp.ones((1, n), dtype=jnp.float32)

    x = jax.random.normal(kx, (batch, input_dim), dtype=jnp.float32)

    out = fuzzy_layer_pallas(x, mean_value, sigma, input_dim, output_dim)
    out = jax.block_until_ready(out)

    ref = fuzzy_layer_ref(x, mean_value, sigma, input_dim, output_dim)
    assert out.shape == (batch, output_dim)
    # Log-space + matmul regrouping changes fp summation order slightly.
    np.testing.assert_allclose(np.asarray(out), np.asarray(ref), rtol=2e-4, atol=1e-5)

    print("KERNEL_OK")
</pallas_src>

<mosaic_0001>
module attributes {stable_mosaic.version = 11 : i64} {
  func.func @_fuzzy_kernel(%arg0: i32, %arg1: memref<4x16xf32, #tpu.memory_space<vmem>>, %arg2: memref<40x8xf32, #tpu.memory_space<vmem>>, %arg3: memref<4x8xf32, #tpu.memory_space<vmem>>) attributes {dimension_semantics = [#tpu.dimension_semantics<parallel>], iteration_bounds = array<i64: 1>, scalar_prefetch = 0 : i64, scratch_operands = 0 : i64, tpu.core_type = #tpu.core_type<tc>, window_params = [{transform_indices = @transform_0, window_bounds = array<i64: 4, 16>}, {pipeline_mode = #tpu.pipeline_mode<synchronous>, transform_indices = @transform_1, window_bounds = array<i64: 40, 8>}, {transform_indices = @transform_2, window_bounds = array<i64: 4, 8>}]} {
    %c0 = arith.constant 0 : index
    %c0_0 = arith.constant 0 : index
    %0 = vector.load %arg1[%c0, %c0_0] : memref<4x16xf32, #tpu.memory_space<vmem>>, vector<4x16xf32>
    %1 = arith.mulf %0, %0 : vector<4x16xf32>
    %cst = arith.constant 1.000000e+00 : f32
    %2 = vector.broadcast %cst : f32 to vector<4x8xf32>
    %3 = tpu.concatenate %1, %0, %2 in 1 : vector<4x16xf32>, vector<4x16xf32>, vector<4x8xf32> -> vector<4x40xf32>
    %c0_1 = arith.constant 0 : index
    %c0_2 = arith.constant 0 : index
    %4 = vector.load %arg2[%c0_1, %c0_2] : memref<40x8xf32, #tpu.memory_space<vmem>>, vector<40x8xf32>
    %cst_3 = arith.constant dense<0.000000e+00> : vector<4x8xf32>
    %5 = tpu.matmul %3, %4, %cst_3 {dimension_numbers = #tpu.dot_dimension_numbers<[1], [0], [0], [1], [0, 0, 1, 1], [], []>} : vector<4x40xf32>, vector<40x8xf32>, vector<4x8xf32> -> vector<4x8xf32>
    %cst_4 = arith.constant 0.000000e+00 : f32
    %6 = vector.broadcast %cst_4 : f32 to vector<4x8xf32>
    %7 = arith.minimumf %5, %6 : vector<4x8xf32>
    %8 = math.exp %7 : vector<4x8xf32>
    %c0_5 = arith.constant 0 : index
    %c0_6 = arith.constant 0 : index
    %9 = vector.load %arg3[%c0_5, %c0_6] : memref<4x8xf32, #tpu.memory_space<vmem>>, vector<4x8xf32>
    tpu.vector_store %arg3[%c0_5, %c0_6], %8 {strides = array<i32>} : memref<4x8xf32, #tpu.memory_space<vmem>>, vector<4x8xf32>,
    return
  }
  func.func @transform_0(%arg0: i32) -> (i32, i32) {
    %c0_i32 = arith.constant 0 : i32
    %c0_i32_0 = arith.constant 0 : i32
    return %arg0, %c0_i32 : i32, i32
  }
  func.func @transform_1(%arg0: i32) -> (i32, i32) {
    %c0_i32 = arith.constant 0 : i32
    %c0_i32_0 = arith.constant 0 : i32
    %c0_i32_1 = arith.constant 0 : i32
    return %c0_i32, %c0_i32_0 : i32, i32
  }
  func.func @transform_2(%arg0: i32) -> (i32, i32) {
    %c0_i32 = arith.constant 0 : i32
    %c0_i32_0 = arith.constant 0 : i32
    return %arg0, %c0_i32 : i32, i32
  }
}

</mosaic_0001>

<bundles_post_ra>
// kernel: tpu_custom_call.1
= control target key start
LH: loop header
LB: loop body
LE: loop exit
PB: predicated region body
PF: predicated region fallthrough
CT: control target
= control target key end

     0   :  { %s177_s15 = smov 16   ;;  %v178_v3 = vmov 0.0|0.0   ;;  %s227_s0 = inlined_call_operand.vmem [shape: f32[4,16], index: 0, kind: input, shape index: {}]   ;;  %s228_s1 = inlined_call_operand.vmem [shape: f32[40,8], index: 1, kind: input, shape index: {}]   ;;  %s229_s2 = inlined_call_operand.hbm [shape: f32[4,8], index: 2, kind: output, shape index: {}]  }
   0x1   :  { %v12_v0 = vld [vmem:[%s227_s0] sm:$0xf]  ;;  %v23_v2 = vld [vmem:[%s228_s1 + $0x8] sm:$0xff]  ;;  %140 = vmatprep.subr.bf16.mxu0 %v178_v3  ;;  %v24_v5 = vld [vmem:[%s228_s1 + $0x10] sm:$0xff] }
   0x2   :  { %v22_v1 = vld [vmem:[%s228_s1] sm:$0xff]  ;;  %15 = vrot.lane.b32.xlu0 %v12_v0, %s177_s15  ;;  %v25_v6 = vld [vmem:[%s228_s1 + $0x18] sm:$0xff] }
   0x3   :  { %v141_v4 = vpack.c.bf16 %v23_v2, %v22_v1 }
   0x4   :  { %7 = vsyncpa [#allocation3], 0  ;;  %v144_v7 = vpack.c.bf16 %v25_v6, %v24_v5  ;;  %vm179_vm0 = vmmov 0   ;;  %v180_v8 = vmov 0.0   ;;  %v26_v9 = vld [vmem:[%s228_s1 + $0x20] sm:$0xff]  ;;  %v13_v10 = vmul.f32 %v12_v0, %v12_v0  ;;  %s181_s21 = smov [#allocation2]  }
   0x5   :  { %142 = vmatpush3.bf16.msra.mxu0 %v141_v4  ;;  %137 = vmatprep.mubr.msk.f32.mxu0 %vm179_vm0, %v180_v8  ;;  %vm18_vm1 = vcmask 130048   ;;  %vm20_vm2 = vcmask 261120   ;;  %vm27_vm3 = vcmask 326656   ;;  %s112_s22 = sshll.u32 %s181_s21, 4  ;;  %vm104_vm4 = vcmask 60416   ;;  %s113_s22 = int_to_ptr.vmem [resolvable:$true] %s112_s22 }
   0x6   :  { %143 = vmatprep.subr.bf16.mxu0 %v178_v3  ;;  %s153_s1 = scalar_lea.vmem %s113_s22, 64  ;;  %p158_p1 = scmp.lt.s32.totalorder %s113_s22, %s113_s22 }
   0x7   :  { %p154_p0 = scmp.ne.s32.totalorder %s113_s22, %s153_s1  ;;  %p159_p2 = scmp.lt.s32.totalorder %s153_s1, %s153_s1 }
   0x9   :  { %145 = vmatpush3.bf16.msra.mxu0 %v144_v7  ;;  %p160_p3 = por %p159_p2, %p158_p1 }
   0xa   :  { %135 = vmatprep.subr.mxu0 %v180_v8 }
   0xb   :  { %p161_p4 = pnand %p160_p3, %p154_p0 }
   0xd   :  { %136 = vmatpush3.msra.mxu0 %v26_v9 }
  0x74   :  { %v16_v11 = vpop.permute.xlu0 %15 }
  0x75   :  { %v19_v12 = vsel %vm18_vm1, %v13_v10, %v16_v11 }
  0x76   :  { %v21_v13 = vsel %vm20_vm2, %v19_v12, 1.0 }
  0x77   :  { %138 = vmatmul.mubr.msk.f32.vlgmr.msra.gmra.mrb[0].mxu0 %vm27_vm3, %v21_v13 }
 0x14a   :  { %v97_v14 = vpop.f32.mrb[0].mxu0 }
 0x14b   :  { %v101_v15 = vmin.f32 %v97_v14, 0.0  ;;  %v139_v16 = vpop.f32.mrb[1].mxu0 }
 0x14d   :  { %v102_v17 = vmul.f32 1.442695, %v101_v15 }
 0x14f   :  { %151 = vpow2.f32 %v102_v17 }
 0x159   :  { %v152_v18 = vpop.eup %151 }
 0x15a   :  { %105 = vst.msk [vmem:[#allocation2] sm:$0xf] %vm104_vm4, %v152_v18 }
 0x15b   :  { %164 = shalt.err (!%p161_p4)
}
 0x15c   :  { %s165_s25 = scalar_lea.hbm %s229_s2, 64 }
 0x15d   :  { %p166_p5 = scmp.ne.s32.totalorder %s229_s2, %s165_s25  ;;  %p169_p6 = scmp.lt.u32.totalorder %s165_s25, %s229_s2 }
 0x15f   :  { %p171_p7 = pnand %p169_p6, %p166_p5 }
 0x161   :  { %174 = shalt.err (!%p171_p7)
}
 0x162   :  { %115 = dma.vmem_to_hbm [thread:$0]  %s113_s22, 64, %s229_s2, [#allocation3]  }
 0x163   :  { %175 = dma.done.wait [#allocation3], 64  }
 0x164   :  { %176 = vsyncadd [#allocation3], 4294967232 }
 0x165   :  { %119 = vsyncpa [#allocation3], 1 }

</bundles_post_ra>
